<compile_context>
chip_gen: v6e
topology: v6e:2x2x1
jax: 0.10.0
libtpu: 0.0.40
codegen_flags: <defaults>
</compile_context>

<pallas_src>
import functools

import jax
import jax.numpy as jnp
from jax.experimental import pallas as pl
from jax.experimental.pallas import tpu as pltpu

P_DROP = 0.3
IN_FEATURES = 180
N_CLASSES = 5
# P(drop) threshold on uint32 bits: keep iff bits >= floor(0.3 * 2^32).
DROP_THRESHOLD = int(P_DROP * (1 << 32)) & 0xFFFFFFFF


def classifier_kernel(seed_ref, x_ref, w_ref, b_ref, o_ref, *, training, block_b):
    x = x_ref[...].astype(jnp.float32)

    if training:
        # Counter-based dropout: splitmix32 hash of (global element index, seed).
        # Portable (plain uint32 VPU ops), grid-invariant, reproducible across
        # any tiling choice.
        row0 = pl.program_id(0) * block_b
        rows = jax.lax.broadcasted_iota(jnp.int32, x.shape, 0) + row0
        cols = jax.lax.broadcasted_iota(jnp.int32, x.shape, 1)
        idx = (rows * IN_FEATURES + cols).astype(jnp.uint32)

        h = idx + seed_ref[0].astype(jnp.uint32) * jnp.uint32(0x9E3779B1)
        h = h ^ (h >> 16)
        h = h * jnp.uint32(0x7FEB352D)
        h = h ^ (h >> 15)
        h = h * jnp.uint32(0x846CA68B)
        h = h ^ (h >> 16)

        keep = h >= jnp.uint32(DROP_THRESHOLD)          # P(keep) = 1 - P_DROP
        x = jnp.where(keep, x * (1.0 / (1.0 - P_DROP)), 0.0)

    # Linear(180 -> 5)
    logits = jnp.dot(x, w_ref[...], preferred_element_type=jnp.float32) + b_ref[...]

    # Softmax(dim=1), numerically stable; exact divide keeps the 1e-5 row-sum tol.
    m = jnp.max(logits, axis=-1, keepdims=True)
    e = jnp.exp(logits - m)
    o_ref[...] = (e / jnp.sum(e, axis=-1, keepdims=True)).astype(o_ref.dtype)


def _pick_block_b(B, tm):
    """Batch tile: whole batch when tiny, else >=2 tiles (v7x megacore), cap at tm."""
    if B <= 256:
        return B
    half = (B + 1) // 2
    half = ((half + 7) // 8) * 8           # (8,128) sublane constraint
    return max(8, min(tm, half))


def classifier_forward(x, params, *, training=False, seed=0, tm=1024):
    B, D = x.shape
    w, b = params["w"], params["b"]
    C = w.shape[1]

    block_b = _pick_block_b(B, tm)
    grid = (pl.cdiv(B, block_b),)

    cost = pl.CostEstimate(
        flops=2 * B * D * C,
        transcendentals=B * C,
        bytes_accessed=x.dtype.itemsize * B * D + 4 * (D * C + C + B * C),
    )

    seed_arr = jnp.asarray([seed], dtype=jnp.int32)
    kernel = functools.partial(classifier_kernel, training=training, block_b=block_b)

    return pl.pallas_call(
        kernel,
        out_shape=jax.ShapeDtypeStruct((B, C), jnp.float32),
        grid_spec=pltpu.PrefetchScalarGridSpec(
            num_scalar_prefetch=1,          # dropout seed -> SMEM
            grid=grid,
            in_specs=[
                pl.BlockSpec((block_b, D), lambda i, seed: (i, 0)),  # x tile
                pl.BlockSpec((D, C), lambda i, seed: (0, 0)),        # weight (resident)
                pl.BlockSpec((1, C), lambda i, seed: (0, 0)),        # bias (resident)
            ],
            out_specs=pl.BlockSpec((block_b, C), lambda i, seed: (i, 0)),
        ),
        compiler_params=pltpu.CompilerParams(
            dimension_semantics=("parallel",),
        ),
        cost_estimate=cost,
    )(seed_arr, x, w, b)


def init_params(key):
    # PyTorch nn.Linear default init: U(-1/sqrt(fan_in), 1/sqrt(fan_in))
    kw, kb = jax.random.split(key)
    bound = 1.0 / jnp.sqrt(jnp.float32(IN_FEATURES))
    return {
        "w": jax.random.uniform(kw, (IN_FEATURES, N_CLASSES), jnp.float32, -bound, bound),
        "b": jax.random.uniform(kb, (1, N_CLASSES), jnp.float32, -bound, bound),
    }


if __name__ == "__main__":
    batch = 8
    key = jax.random.PRNGKey(0)
    kx, kp = jax.random.split(key)

    x = jax.random.normal(kx, (batch, IN_FEATURES), jnp.float32)
    params = init_params(kp)

    # Eval-mode forward (dropout = identity) — deterministic, check vs pure JAX.
    out = jax.block_until_ready(classifier_forward(x, params, training=False))
    assert out.shape == (batch, N_CLASSES)
    assert bool(jnp.all(jnp.isfinite(out)))
    assert bool(jnp.all((out >= 0.0) & (out <= 1.0)))
    assert bool(jnp.all(jnp.abs(jnp.sum(out, axis=-1) - 1.0) < 1e-5))
    ref = jax.nn.softmax(x @ params["w"] + params["b"], axis=-1)
    assert bool(jnp.allclose(out, ref, atol=1e-5))

    # Training-mode forward (in-kernel counter-based dropout) — rows are a softmax.
    out_t = jax.block_until_ready(classifier_forward(x, params, training=True, seed=123))
    assert out_t.shape == (batch, N_CLASSES)
    assert bool(jnp.all(jnp.isfinite(out_t)))
    assert bool(jnp.all(jnp.abs(jnp.sum(out_t, axis=-1) - 1.0) < 1e-5))

    print("KERNEL_OK")
</pallas_src>

<mosaic_0001>
module attributes {stable_mosaic.version = 11 : i64} {
  func.func @classifier_kernel(%arg0: i32, %arg1: memref<1xi32, #tpu.memory_space<smem>>, %arg2: memref<8x180xf32, #tpu.memory_space<vmem>>, %arg3: memref<180x5xf32, #tpu.memory_space<vmem>>, %arg4: memref<1x5xf32, #tpu.memory_space<vmem>>, %arg5: memref<8x5xf32, #tpu.memory_space<vmem>>) attributes {dimension_semantics = [#tpu.dimension_semantics<parallel>], iteration_bounds = array<i64: 1>, scalar_prefetch = 1 : i64, scratch_operands = 0 : i64, tpu.core_type = #tpu.core_type<tc>, window_params = [{transform_indices = @transform_0, window_bounds = array<i64: 8, 180>}, {pipeline_mode = #tpu.pipeline_mode<synchronous>, transform_indices = @transform_1, window_bounds = array<i64: 180, 5>}, {pipeline_mode = #tpu.pipeline_mode<synchronous>, transform_indices = @transform_2, window_bounds = array<i64: 1, 5>}, {transform_indices = @transform_3, window_bounds = array<i64: 8, 5>}]} {
    %c0 = arith.constant 0 : index
    %c0_0 = arith.constant 0 : index
    %0 = vector.load %arg2[%c0, %c0_0] : memref<8x180xf32, #tpu.memory_space<vmem>>, vector<8x180xf32>
    %c0_1 = arith.constant 0 : index
    %c0_2 = arith.constant 0 : index
    %1 = vector.load %arg3[%c0_1, %c0_2] : memref<180x5xf32, #tpu.memory_space<vmem>>, vector<180x5xf32>
    %cst = arith.constant dense<0.000000e+00> : vector<8x5xf32>
    %2 = tpu.matmul %0, %1, %cst {dimension_numbers = #tpu.dot_dimension_numbers<[1], [0], [0], [1], [0, 0, 1, 1], [], []>} : vector<8x180xf32>, vector<180x5xf32>, vector<8x5xf32> -> vector<8x5xf32>
    %c0_3 = arith.constant 0 : index
    %c0_4 = arith.constant 0 : index
    %3 = vector.load %arg4[%c0_3, %c0_4] : memref<1x5xf32, #tpu.memory_space<vmem>>, vector<1x5xf32>
    %4 = vector.broadcast %3 : vector<1x5xf32> to vector<8x5xf32>
    %5 = arith.addf %2, %4 : vector<8x5xf32>
    %cst_5 = arith.constant dense<0xFF800000> : vector<8xf32>
    %6 = vector.multi_reduction <maximumf>, %5, %cst_5 [1] : vector<8x5xf32> to vector<8xf32>
    %7 = vector.shape_cast %6 : vector<8xf32> to vector<8x1xf32>
    %8 = vector.broadcast %7 : vector<8x1xf32> to vector<8x5xf32>
    %9 = arith.subf %5, %8 : vector<8x5xf32>
    %10 = math.exp %9 : vector<8x5xf32>
    %cst_6 = arith.constant dense<0.000000e+00> : vector<8xf32>
    %11 = vector.multi_reduction <add>, %10, %cst_6 [1] : vector<8x5xf32> to vector<8xf32>
    %12 = vector.shape_cast %11 : vector<8xf32> to vector<8x1xf32>
    %13 = vector.broadcast %12 : vector<8x1xf32> to vector<8x5xf32>
    %14 = arith.divf %10, %13 : vector<8x5xf32>
    %c0_7 = arith.constant 0 : index
    %c0_8 = arith.constant 0 : index
    %15 = vector.load %arg5[%c0_7, %c0_8] : memref<8x5xf32, #tpu.memory_space<vmem>>, vector<8x5xf32>
    tpu.vector_store %arg5[%c0_7, %c0_8], %14 {strides = array<i32>} : memref<8x5xf32, #tpu.memory_space<vmem>>, vector<8x5xf32>,
    return
  }
  func.func @transform_0(%arg0: i32, %arg1: memref<1xi32, #tpu.memory_space<smem>>) -> (i32, i32) {
    %c0_i32 = arith.constant 0 : i32
    %c0_i32_0 = arith.constant 0 : i32
    return %arg0, %c0_i32 : i32, i32
  }
  func.func @transform_1(%arg0: i32, %arg1: memref<1xi32, #tpu.memory_space<smem>>) -> (i32, i32) {
    %c0_i32 = arith.constant 0 : i32
    %c0_i32_0 = arith.constant 0 : i32
    %c0_i32_1 = arith.constant 0 : i32
    return %c0_i32, %c0_i32_0 : i32, i32
  }
  func.func @transform_2(%arg0: i32, %arg1: memref<1xi32, #tpu.memory_space<smem>>) -> (i32, i32) {
    %c0_i32 = arith.constant 0 : i32
    %c0_i32_0 = arith.constant 0 : i32
    %c0_i32_1 = arith.constant 0 : i32
    return %c0_i32, %c0_i32_0 : i32, i32
  }
  func.func @transform_3(%arg0: i32, %arg1: memref<1xi32, #tpu.memory_space<smem>>) -> (i32, i32) {
    %c0_i32 = arith.constant 0 : i32
    %c0_i32_0 = arith.constant 0 : i32
    return %arg0, %c0_i32 : i32, i32
  }
}

</mosaic_0001>

<bundles_post_ra>
// kernel: tpu_custom_call.1
= control target key start
LH: loop header
LB: loop body
LE: loop exit
PB: predicated region body
PF: predicated region fallthrough
CT: control target
= control target key end

     0   :  { %v185_v1 = vmov 0.0   ;;  %vm49_vm0 = vcmask 424960   ;;  %s319_s0 = inlined_call_operand.<no memory space> [shape: s32[1], index: 0, kind: input, shape index: {}]   ;;  %s320_s1 = inlined_call_operand.vmem [shape: f32[8,180], index: 1, kind: input, shape index: {}]   ;;  %s321_s2 = inlined_call_operand.vmem [shape: f32[180,5], index: 2, kind: input, shape index: {}]   ;;  %s322_s3 = inlined_call_operand.vmem [shape: f32[1,5], index: 3, kind: input, shape index: {}]   ;;  %s323_s4 = inlined_call_operand.hbm [shape: f32[8,5], index: 4, kind: output, shape index: {}]  }
   0x1   :  { %v34_v0 = vld [vmem:[%s321_s2 + $0x78] sm:$0xff]  ;;  %57 = vmatprep.subr.mxu0 %v185_v1  ;;  %v33_v2 = vld [vmem:[%s321_s2 + $0x70] sm:$0xff]  ;;  %v32_v3 = vld [vmem:[%s321_s2 + $0x68] sm:$0xff] }
   0x2   :  { %58 = vmatpush1.msra.mxu0 %v34_v0  ;;  %v31_v4 = vld [vmem:[%s321_s2 + $0x60] sm:$0xff]  ;;  %v30_v5 = vld [vmem:[%s321_s2 + $0x58] sm:$0xff]  ;;  %v18_v6 = vld [vmem:[%s320_s1 + $0x8] sm:$0xff] }
   0x3   :  { %59 = vmatprep.subr.mxu0 %v185_v1  ;;  %156 = vmatprep.mubr.msk.f32.mxu0 %vm49_vm0, %v18_v6 }
   0x4   :  { %60 = vmatpush1.msra.mxu0 %v33_v2 }
   0x5   :  { %61 = vmatprep.subr.mxu0 %v185_v1 }
   0x6   :  { %62 = vmatpush1.msra.mxu0 %v32_v3 }
   0x7   :  { %63 = vmatprep.subr.mxu0 %v185_v1 }
   0x8   :  { %64 = vmatpush1.msra.mxu0 %v31_v4 }
   0x9   :  { %10 = vsyncpa [#allocation5], 0  ;;  %65 = vmatprep.subr.mxu0 %v185_v1  ;;  %v29_v7 = vld [vmem:[%s321_s2 + $0x50] sm:$0xff]  ;;  %v28_v8 = vld [vmem:[%s321_s2 + $0x48] sm:$0xff]  ;;  %vm53_vm1 = vcmask 1043456   ;;  %vm127_vm2 = vcmask 39936  }
   0xa   :  { %66 = vmatpush1.msra.mxu0 %v30_v5  ;;  %v27_v9 = vld [vmem:[%s321_s2 + $0x40] sm:$0xff]  ;;  %v26_v10 = vld [vmem:[%s321_s2 + $0x38] sm:$0xff]  ;;  %v25_v11 = vld [vmem:[%s321_s2 + $0x30] sm:$0xff] }
   0xb   :  { %67 = vmatprep.subr.mxu0 %v185_v1  ;;  %v24_v12 = vld [vmem:[%s321_s2 + $0x28] sm:$0xff]  ;;  %v23_v13 = vld [vmem:[%s321_s2 + $0x20] sm:$0xff]  ;;  %v22_v14 = vld [vmem:[%s321_s2 + $0x18] sm:$0xff] }
   0xc   :  { %68 = vmatpush1.msra.mxu0 %v29_v7  ;;  %v21_v15 = vld [vmem:[%s321_s2 + $0x10] sm:$0xff]  ;;  %v20_v16 = vld [vmem:[%s321_s2 + $0x8] sm:$0xff]  ;;  %v19_v17 = vld [vmem:[%s321_s2] sm:$0xff] }
   0xd   :  { %69 = vmatprep.subr.mxu0 %v185_v1  ;;  %v41_v18 = vld [vmem:[%s321_s2 + $0xb0] sm:$0xf]  ;;  %v40_v19 = vld [vmem:[%s321_s2 + $0xa8] sm:$0xff]  ;;  %v39_v20 = vld [vmem:[%s321_s2 + $0xa0] sm:$0xff] }
   0xe   :  { %70 = vmatpush1.msra.mxu0 %v28_v8  ;;  %v38_v21 = vld [vmem:[%s321_s2 + $0x98] sm:$0xff]  ;;  %v37_v22 = vld [vmem:[%s321_s2 + $0x90] sm:$0xff]  ;;  %v36_v23 = vld [vmem:[%s321_s2 + $0x88] sm:$0xff] }
   0xf   :  { %71 = vmatprep.subr.mxu0 %v185_v1  ;;  %v35_v24 = vld [vmem:[%s321_s2 + $0x80] sm:$0xff] }
  0x10   :  { %72 = vmatpush1.msra.mxu0 %v27_v9  ;;  %v17_v25 = vld [vmem:[%s320_s1] sm:$0xff]  ;;  %s186_s1 = smov [#allocation4]  }
  0x11   :  { %73 = vmatprep.subr.mxu0 %v185_v1  ;;  %v154_v26 = vld [vmem:[%s322_s3] ss:$0 sm:$0xff]  ;;  %s146_s2 = sshll.u32 %s186_s1, 4  ;;  %s147_s2 = int_to_ptr.vmem [resolvable:$true] %s146_s2 }
  0x12   :  { %74 = vmatpush1.msra.mxu0 %v26_v10  ;;  %s163_s3 = scalar_lea.vmem %s147_s2, 128  ;;  %p168_p1 = scmp.lt.s32.totalorder %s147_s2, %s147_s2 }
  0x13   :  { %75 = vmatprep.subr.mxu0 %v185_v1  ;;  %p164_p0 = scmp.ne.s32.totalorder %s147_s2, %s163_s3  ;;  %p169_p2 = scmp.lt.s32.totalorder %s163_s3, %s163_s3 }
  0x14   :  { %76 = vmatpush1.msra.mxu0 %v25_v11 }
  0x15   :  { %77 = vmatprep.subr.mxu0 %v185_v1  ;;  %p170_p3 = por %p169_p2, %p168_p1 }
  0x16   :  { %78 = vmatpush1.msra.mxu0 %v24_v12 }
  0x17   :  { %79 = vmatprep.subr.mxu0 %v185_v1  ;;  %p171_p4 = pnand %p170_p3, %p164_p0 }
  0x18   :  { %80 = vmatpush1.msra.mxu0 %v23_v13 }
  0x19   :  { %81 = vmatprep.subr.mxu0 %v185_v1 }
  0x1a   :  { %82 = vmatpush1.msra.mxu0 %v22_v14 }
  0x1b   :  { %83 = vmatprep.subr.mxu0 %v185_v1 }
  0x1c   :  { %84 = vmatpush1.msra.mxu0 %v21_v15 }
  0x1d   :  { %85 = vmatprep.subr.mxu0 %v185_v1 }
  0x1e   :  { %86 = vmatpush1.msra.mxu0 %v20_v16 }
  0x1f   :  { %87 = vmatprep.subr.mxu0 %v185_v1 }
  0x20   :  { %88 = vmatpush1.msra.mxu0 %v19_v17 }
  0x21   :  { %107 = vmatprep.subr.mxu0 %v185_v1 }
  0x22   :  { %155 = vmatpush2.msk.msra.mxu0 %vm53_vm1, %v41_v18 }
  0x23   :  { %109 = vmatprep.subr.mxu0 %v185_v1 }
  0x24   :  { %110 = vmatpush2.msra.mxu0 %v40_v19 }
  0x25   :  { %111 = vmatprep.subr.mxu0 %v185_v1 }
  0x26   :  { %112 = vmatpush2.msra.mxu0 %v39_v20 }
  0x27   :  { %113 = vmatprep.subr.mxu0 %v185_v1 }
  0x28   :  { %114 = vmatpush2.msra.mxu0 %v38_v21 }
  0x29   :  { %115 = vmatprep.subr.mxu0 %v185_v1 }
  0x2a   :  { %116 = vmatpush2.msra.mxu0 %v37_v22 }
  0x2b   :  { %117 = vmatprep.subr.mxu0 %v185_v1 }
  0x2c   :  { %118 = vmatpush2.msra.mxu0 %v36_v23 }
  0x2d   :  { %119 = vmatprep.subr.mxu0 %v185_v1 }
  0x2e   :  { %120 = vmatpush2.msra.mxu0 %v35_v24 }
  0x2f   :  { %122 = vmatmul.mubr.f32.vlgmr.msra.gmra.mxu0 %v17_v25 }
  0xef   :  { %v123_v27 = vpop.f32.mrf.mxu0 }
  0xf0   :  { %v124_v28 = vadd.f32 %v154_v26, %v123_v27 }
  0xf1   :  { %v125_v29 = vpop.f32.mrf.mxu0 }
  0xf2   :  { %v128_v30 = vsel %vm127_vm2, %v124_v28, -inf }
  0xf3   :  { %129 = vmax.xlane.f32.xlu0 %v128_v30 }
 0x17c   :  { %v130_v31 = vpop.xlane.xlu0 %129 }
 0x17d   :  { %v131_v32 = vsub.f32 %v124_v28, %v130_v31 }
 0x17f   :  { %v132_v33 = vmul.f32 1.442695, %v131_v32 }
 0x181   :  { %159 = vpow2.f32 %v132_v33 }
 0x18e   :  { %v160_v34 = vpop.eup %159 }
 0x18f   :  { %v134_v35 = vsel %vm127_vm2, %v160_v34, 0.0 }
 0x190   :  { %135 = vadd.xlane.f32.xlu0 %v134_v35 }
 0x219   :  { %v136_v36 = vpop.xlane.xlu0 %135 }
 0x21a   :  { %161 = vrcp.f32 %v136_v36 }
 0x227   :  { %v162_v37 = vpop.eup %161 }
 0x228   :  { %v138_v38 = vmul.f32 %v162_v37, %v160_v34 }
 0x22a   :  { %139 = vst.msk [vmem:[#allocation4] sm:$0xff] %vm127_vm2, %v138_v38 }
 0x22b   :  { %174 = shalt.err (!%p171_p4)
}
 0x22c   :  { %149 = dma.vmem_to_hbm [thread:$0]  %s147_s2, 128, %s323_s4, [#allocation5]  }
 0x22d   :  { %183 = dma.done.wait [#allocation5], 128  }
 0x22e   :  { %184 = vsyncadd [#allocation5], 4294967168 }
 0x22f   :  { %153 = vsyncpa [#allocation5], 1 }

</bundles_post_ra>
